<compile_context>
chip_gen: v5e
topology: v5e:2x2
jax: 0.10.0
libtpu: 0.0.40
codegen_flags: <defaults>
</compile_context>

<pallas_src>
import jax
import jax.numpy as jnp
from jax.experimental import pallas as pl
from jax.experimental.pallas import tpu as pltpu


def _round_up(x, m):
    return (x + m - 1) // m * m


def _score_kernel(z_ref, w1_ref, b1_ref, w2_ref, s_ref):
    """Scores for a block of TR (node, metapath) rows: tanh(z@W1+b1) . w2."""
    h = jnp.tanh(
        jnp.dot(z_ref[...], w1_ref[...], preferred_element_type=jnp.float32)
        + b1_ref[...]
    )
    # Output-width-1 projection: VPU mult + XLU lane reduce (keeps MXU free).
    s_ref[...] = jnp.sum(h * w2_ref[...], axis=-1, keepdims=True)


def _apply_kernel(beta_ref, z_ref, out_ref):
    """out[n, :] = beta_row * z[n, :] on a lane-dense (TN, M*D) block."""
    out_ref[...] = (beta_ref[...] * z_ref[...]).astype(out_ref.dtype)


def semantic_attention(z, w1, b1, w2, *, row_block=512, node_block=512):
    """HAN semantic attention forward.

    z : (N, M, D) float32  per-node, per-metapath embeddings
    w1: (D, H)  b1: (H,)   first Linear (weight stored pre-transposed)
    w2: (H, 1)             second Linear, no bias
    returns (N, M, D) = softmax_M(mean_N(project(z))) * z
    """
    N, M, D = z.shape
    H = w1.shape[1]
    w1f = w1.astype(jnp.float32)
    b1_row = b1.reshape(1, H).astype(jnp.float32)
    w2_row = w2.reshape(1, H).astype(jnp.float32)

    # ---------------- Pass 1: projection scores over (N*M) rows -------------
    rows = N * M
    tr = min(row_block, _round_up(rows, 8))          # multiple of 8
    rows_pad = _round_up(rows, tr)
    z2 = z.reshape(rows, D).astype(jnp.float32)
    if rows_pad != rows:
        z2 = jnp.pad(z2, ((0, rows_pad - rows), (0, 0)))

    scores = pl.pallas_call(
        _score_kernel,
        out_shape=jax.ShapeDtypeStruct((rows_pad, 1), jnp.float32),
        grid_spec=pltpu.PrefetchScalarGridSpec(
            num_scalar_prefetch=0,
            grid=(rows_pad // tr,),
            in_specs=[
                pl.BlockSpec((tr, D), lambda i: (i, 0)),   # z rows
                pl.BlockSpec((D, H), lambda i: (0, 0)),    # W1 (grid-invariant)
                pl.BlockSpec((1, H), lambda i: (0, 0)),    # b1 (grid-invariant)
                pl.BlockSpec((1, H), lambda i: (0, 0)),    # w2 (grid-invariant)
            ],
            out_specs=pl.BlockSpec((tr, 1), lambda i: (i, 0)),
        ),
        compiler_params=pltpu.CompilerParams(
            dimension_semantics=("parallel",)),
    )(z2, w1f, b1_row, w2_row)

    # Tiny epilogue (M scalars): mean over nodes, softmax over metapaths.
    # Deliberately left to XLA — it is O(M) work and not worth a kernel.
    w_mean = scores[:rows, 0].reshape(N, M).mean(axis=0)        # (M,)
    beta = jax.nn.softmax(w_mean)                               # (M,)

    # ---------------- Pass 2: broadcast multiply, lane-dense layout ---------
    md = M * D
    tn = min(node_block, _round_up(N, 8))             # multiple of 8
    n_pad = _round_up(N, tn)
    z_rows = z.reshape(N, md)
    if n_pad != N:
        z_rows = jnp.pad(z_rows, ((0, n_pad - N), (0, 0)))
    beta_row = jnp.repeat(beta, D).reshape(1, md).astype(z.dtype)

    out2 = pl.pallas_call(
        _apply_kernel,
        out_shape=jax.ShapeDtypeStruct((n_pad, md), z.dtype),
        grid_spec=pltpu.PrefetchScalarGridSpec(
            num_scalar_prefetch=0,
            grid=(n_pad // tn,),
            in_specs=[
                pl.BlockSpec((1, md), lambda i: (0, 0)),    # beta (invariant)
                pl.BlockSpec((tn, md), lambda i: (i, 0)),   # z node rows
            ],
            out_specs=pl.BlockSpec((tn, md), lambda i: (i, 0)),
        ),
        compiler_params=pltpu.CompilerParams(
            dimension_semantics=("parallel",)),
    )(beta_row, z_rows)

    return out2[:N].reshape(N, M, D)


def _reference(z, w1, b1, w2):
    hp = jax.lax.Precision.HIGHEST
    h = jnp.tanh(jnp.einsum("nmd,dh->nmh", z, w1, precision=hp)
                 + b1[None, None, :])
    w = jnp.einsum("nmh,ho->nmo", h, w2, precision=hp)   # (N, M, 1)
    w_mean = jnp.mean(w, axis=0)                         # (M, 1)
    beta = jax.nn.softmax(w_mean, axis=0)                # (M, 1)
    return beta[None, :, :] * z                          # (N, M, D)


if __name__ == "__main__":
    fn = jax.jit(semantic_attention)

    # Primary (lane-aligned) case: N=64 nodes, M=4 metapaths, D=H=128.
    key = jax.random.PRNGKey(0)
    kz, k1, kb, k2 = jax.random.split(key, 4)
    N, M, D, H = 64, 4, 128, 128
    z = jax.random.normal(kz, (N, M, D), dtype=jnp.float32)
    w1 = 0.1 * jax.random.normal(k1, (D, H), dtype=jnp.float32)
    b1 = 0.1 * jax.random.normal(kb, (H,), dtype=jnp.float32)
    w2 = 0.1 * jax.random.normal(k2, (H, 1), dtype=jnp.float32)

    out = jax.block_until_ready(fn(z, w1, b1, w2))
    ref = _reference(z, w1, b1, w2)
    assert out.shape == (N, M, D)
    assert jnp.allclose(out, ref, atol=1e-5, rtol=1e-5), "mismatch (aligned case)"

    # Ragged case exercising the padding / remainder handling.
    key2 = jax.random.PRNGKey(1)
    kz, k1, kb, k2 = jax.random.split(key2, 4)
    N2, M2, D2, H2 = 37, 5, 96, 64
    z_b = jax.random.normal(kz, (N2, M2, D2), dtype=jnp.float32)
    w1_b = 0.1 * jax.random.normal(k1, (D2, H2), dtype=jnp.float32)
    b1_b = 0.1 * jax.random.normal(kb, (H2,), dtype=jnp.float32)
    w2_b = 0.1 * jax.random.normal(k2, (H2, 1), dtype=jnp.float32)

    out_b = jax.block_until_ready(fn(z_b, w1_b, b1_b, w2_b))
    ref_b = _reference(z_b, w1_b, b1_b, w2_b)
    assert out_b.shape == (N2, M2, D2)
    assert jnp.allclose(out_b, ref_b, atol=1e-5, rtol=1e-5), "mismatch (ragged case)"

    print("KERNEL_OK")
</pallas_src>

<mosaic_0001>
module attributes {stable_mosaic.version = 11 : i64} {
  func.func @_score_kernel(%arg0: i32, %arg1: memref<256x128xf32, #tpu.memory_space<vmem>>, %arg2: memref<128x128xf32, #tpu.memory_space<vmem>>, %arg3: memref<1x128xf32, #tpu.memory_space<vmem>>, %arg4: memref<1x128xf32, #tpu.memory_space<vmem>>, %arg5: memref<256x1xf32, #tpu.memory_space<vmem>>) attributes {dimension_semantics = [#tpu.dimension_semantics<parallel>], iteration_bounds = array<i64: 1>, scalar_prefetch = 0 : i64, scratch_operands = 0 : i64, tpu.core_type = #tpu.core_type<tc>, window_params = [{transform_indices = @transform_0, window_bounds = array<i64: 256, 128>}, {pipeline_mode = #tpu.pipeline_mode<synchronous>, transform_indices = @transform_1, window_bounds = array<i64: 128, 128>}, {pipeline_mode = #tpu.pipeline_mode<synchronous>, transform_indices = @transform_2, window_bounds = array<i64: 1, 128>}, {pipeline_mode = #tpu.pipeline_mode<synchronous>, transform_indices = @transform_3, window_bounds = array<i64: 1, 128>}, {transform_indices = @transform_4, window_bounds = array<i64: 256, 1>}]} {
    %c0 = arith.constant 0 : index
    %c0_0 = arith.constant 0 : index
    %0 = vector.load %arg1[%c0, %c0_0] : memref<256x128xf32, #tpu.memory_space<vmem>>, vector<256x128xf32>
    %c0_1 = arith.constant 0 : index
    %c0_2 = arith.constant 0 : index
    %1 = vector.load %arg2[%c0_1, %c0_2] : memref<128x128xf32, #tpu.memory_space<vmem>>, vector<128x128xf32>
    %cst = arith.constant dense<0.000000e+00> : vector<256x128xf32>
    %2 = tpu.matmul %0, %1, %cst {dimension_numbers = #tpu.dot_dimension_numbers<[1], [0], [0], [1], [0, 0, 1, 1], [], []>} : vector<256x128xf32>, vector<128x128xf32>, vector<256x128xf32> -> vector<256x128xf32>
    %c0_3 = arith.constant 0 : index
    %c0_4 = arith.constant 0 : index
    %3 = vector.load %arg3[%c0_3, %c0_4] : memref<1x128xf32, #tpu.memory_space<vmem>>, vector<1x128xf32>
    %4 = vector.broadcast %3 : vector<1x128xf32> to vector<256x128xf32>
    %5 = arith.addf %2, %4 : vector<256x128xf32>
    %6 = math.tanh %5 : vector<256x128xf32>
    %c0_5 = arith.constant 0 : index
    %c0_6 = arith.constant 0 : index
    %7 = vector.load %arg4[%c0_5, %c0_6] : memref<1x128xf32, #tpu.memory_space<vmem>>, vector<1x128xf32>
    %8 = vector.broadcast %7 : vector<1x128xf32> to vector<256x128xf32>
    %9 = arith.mulf %6, %8 : vector<256x128xf32>
    %cst_7 = arith.constant dense<0.000000e+00> : vector<256xf32>
    %10 = vector.multi_reduction <add>, %9, %cst_7 [1] : vector<256x128xf32> to vector<256xf32>
    %11 = vector.shape_cast %10 : vector<256xf32> to vector<256x1xf32>
    %c0_8 = arith.constant 0 : index
    %c0_9 = arith.constant 0 : index
    %12 = vector.load %arg5[%c0_8, %c0_9] : memref<256x1xf32, #tpu.memory_space<vmem>>, vector<256x1xf32>
    tpu.vector_store %arg5[%c0_8, %c0_9], %11 {strides = array<i32>} : memref<256x1xf32, #tpu.memory_space<vmem>>, vector<256x1xf32>,
    return
  }
  func.func @transform_0(%arg0: i32) -> (i32, i32) {
    %c0_i32 = arith.constant 0 : i32
    %c0_i32_0 = arith.constant 0 : i32
    return %arg0, %c0_i32 : i32, i32
  }
  func.func @transform_1(%arg0: i32) -> (i32, i32) {
    %c0_i32 = arith.constant 0 : i32
    %c0_i32_0 = arith.constant 0 : i32
    %c0_i32_1 = arith.constant 0 : i32
    return %c0_i32, %c0_i32_0 : i32, i32
  }
  func.func @transform_2(%arg0: i32) -> (i32, i32) {
    %c0_i32 = arith.constant 0 : i32
    %c0_i32_0 = arith.constant 0 : i32
    %c0_i32_1 = arith.constant 0 : i32
    return %c0_i32, %c0_i32_0 : i32, i32
  }
  func.func @transform_3(%arg0: i32) -> (i32, i32) {
    %c0_i32 = arith.constant 0 : i32
    %c0_i32_0 = arith.constant 0 : i32
    %c0_i32_1 = arith.constant 0 : i32
    return %c0_i32, %c0_i32_0 : i32, i32
  }
  func.func @transform_4(%arg0: i32) -> (i32, i32) {
    %c0_i32 = arith.constant 0 : i32
    %c0_i32_0 = arith.constant 0 : i32
    return %arg0, %c0_i32 : i32, i32
  }
}

module attributes {stable_mosaic.version = 11 : i64} {
  func.func @_apply_kernel(%arg0: i32, %arg1: memref<1x512xf32, #tpu.memory_space<vmem>>, %arg2: memref<64x512xf32, #tpu.memory_space<vmem>>, %arg3: memref<64x512xf32, #tpu.memory_space<vmem>>) attributes {dimension_semantics = [#tpu.dimension_semantics<parallel>], iteration_bounds = array<i64: 1>, scalar_prefetch = 0 : i64, scratch_operands = 0 : i64, tpu.core_type = #tpu.core_type<tc>, window_params = [{pipeline_mode = #tpu.pipeline_mode<synchronous>, transform_indices = @transform_0, window_bounds = array<i64: 1, 512>}, {transform_indices = @transform_1, window_bounds = array<i64: 64, 512>}, {transform_indices = @transform_2, window_bounds = array<i64: 64, 512>}]} {
    %c0 = arith.constant 0 : index
    %c0_0 = arith.constant 0 : index
    %0 = vector.load %arg1[%c0, %c0_0] : memref<1x512xf32, #tpu.memory_space<vmem>>, vector<1x512xf32>
    %c0_1 = arith.constant 0 : index
    %c0_2 = arith.constant 0 : index
    %1 = vector.load %arg2[%c0_1, %c0_2] : memref<64x512xf32, #tpu.memory_space<vmem>>, vector<64x512xf32>
    %2 = vector.broadcast %0 : vector<1x512xf32> to vector<64x512xf32>
    %3 = arith.mulf %2, %1 : vector<64x512xf32>
    %c0_3 = arith.constant 0 : index
    %c0_4 = arith.constant 0 : index
    %4 = vector.load %arg3[%c0_3, %c0_4] : memref<64x512xf32, #tpu.memory_space<vmem>>, vector<64x512xf32>
    tpu.vector_store %arg3[%c0_3, %c0_4], %3 {strides = array<i32>} : memref<64x512xf32, #tpu.memory_space<vmem>>, vector<64x512xf32>,
    return
  }
  func.func @transform_0(%arg0: i32) -> (i32, i32) {
    %c0_i32 = arith.constant 0 : i32
    %c0_i32_0 = arith.constant 0 : i32
    %c0_i32_1 = arith.constant 0 : i32
    return %c0_i32, %c0_i32_0 : i32, i32
  }
  func.func @transform_1(%arg0: i32) -> (i32, i32) {
    %c0_i32 = arith.constant 0 : i32
    %c0_i32_0 = arith.constant 0 : i32
    return %arg0, %c0_i32 : i32, i32
  }
  func.func @transform_2(%arg0: i32) -> (i32, i32) {
    %c0_i32 = arith.constant 0 : i32
    %c0_i32_0 = arith.constant 0 : i32
    return %arg0, %c0_i32 : i32, i32
  }
}

</mosaic_0001>

<bundles_post_ra>
// kernel: squeeze.1
= control target key start
LH: loop header
LB: loop body
LE: loop exit
PB: predicated region body
PF: predicated region fallthrough
CT: control target
= control target key end

     0   :  { %s354_s8 = smov 116   ;;  %s355_s9 = smov 108   ;;  %vm7_vm0 = vcmask 31744   ;;  %s653_s0 = inlined_call_operand.vmem [shape: f32[256], index: 0, kind: input, shape index: {}]   ;;  %s654_s1 = inlined_call_operand.vmem [shape: f32[64,4], index: 1, kind: output, shape index: {}]  }
   0x1   :  { %v4_v0 = vld [vmem:[%s653_s0] sm:$0x3]  ;;  %s353_s0 = smov 124   ;;  %s356_s10 = smov 120  }
   0x2   :  { %5 = vst [vmem:[#allocation0] sm:$0x3] %v4_v0  ;;  %s357_s11 = smov 112   ;;  %s358_s12 = smov 104  }
   0x3   :  { %s359_s13 = smov 100   ;;  %s360_s14 = smov 96  }
   0x4   :  { %s361_s15 = smov 92   ;;  %s362_s16 = smov 88  }
   0x5   :  { %s363_s17 = smov 84   ;;  %s364_s18 = smov 80  }
   0x6   :  { %s365_s19 = smov 76   ;;  %s366_s20 = smov 72  }
   0x7   :  { %s367_s21 = smov 68   ;;  %s368_s22 = smov 64  }
   0x8   :  { %s369_s23 = smov 60   ;;  %s370_s24 = smov 56  }
   0x9   :  { %v11_v1 = vld [vmem:[#allocation0] sm:$0x3]   ;;  %s371_s25 = smov 52   ;;  %s372_s26 = smov 48  }
   0xa   :  { %v27_v2 = vld [vmem:[#allocation0] sm:$0x3]   ;;  %12 = vrot.lane.b32.xlu0 %v11_v1, %s353_s0  ;;  %s373_s27 = smov 44   ;;  %s374_s28 = smov 40  }
   0xb   :  { %28 = vrot.lane.b32.xlu1 %v27_v2, %s354_s8  ;;  %v43_v3 = vld [vmem:[#allocation0] sm:$0x3]   ;;  %s375_s29 = smov 36   ;;  %s376_s30 = smov 32  }
   0xc   :  { %44 = vrot.lane.b32.xlu2 %v43_v3, %s355_s9  ;;  %v19_v4 = vld [vmem:[#allocation0] sm:$0x3]   ;;  %s377_s2 = smov 28   ;;  %s378_s3 = smov 24  }
   0xd   :  { %v35_v5 = vld [vmem:[#allocation0] sm:$0x3]   ;;  %s379_s4 = smov 20   ;;  %s380_s5 = smov 16  }
   0xe   :  { %v51_v6 = vld [vmem:[#allocation0] sm:$0x3]   ;;  %s381_s6 = smov 12   ;;  %s382_s7 = smov 8  }
   0xf   :  { %v59_v7 = vld [vmem:[#allocation0] sm:$0x3]   ;;  %s383_s0 = smov 4  }
  0x10   :  { %v67_v8 = vld [vmem:[#allocation0] sm:$0x3]  }
  0x11   :  { %v75_v9 = vld [vmem:[#allocation0] sm:$0x3]  }
  0x12   :  { %20 = vrot.lane.b32.xlu0 %v19_v4, %s356_s10  ;;  %v83_v10 = vld [vmem:[#allocation0] sm:$0x3]  }
  0x13   :  { %36 = vrot.lane.b32.xlu1 %v35_v5, %s357_s11  ;;  %v91_v11 = vld [vmem:[#allocation0] sm:$0x3]  }
  0x14   :  { %52 = vrot.lane.b32.xlu2 %v51_v6, %s358_s12  ;;  %v99_v12 = vld [vmem:[#allocation0] sm:$0x3]  }
  0x15   :  { %v107_v13 = vld [vmem:[#allocation0] sm:$0x3]  }
  0x16   :  { %v115_v14 = vld [vmem:[#allocation0] sm:$0x3]  }
  0x17   :  { %v123_v15 = vld [vmem:[#allocation0] sm:$0x3]  }
  0x18   :  { %v131_v16 = vld [vmem:[#allocation0] sm:$0x3]  }
  0x19   :  { %v139_v17 = vld [vmem:[#allocation0] sm:$0x3]  }
  0x1a   :  { %60 = vrot.lane.b32.xlu0 %v59_v7, %s359_s13  ;;  %v147_v18 = vld [vmem:[#allocation0] sm:$0x3]  }
  0x1b   :  { %68 = vrot.lane.b32.xlu1 %v67_v8, %s360_s14  ;;  %v155_v19 = vld [vmem:[#allocation0] sm:$0x3]  }
  0x1c   :  { %76 = vrot.lane.b32.xlu2 %v75_v9, %s361_s15  ;;  %v163_v20 = vld [vmem:[#allocation0] sm:$0x3]  }
  0x1d   :  { %v171_v21 = vld [vmem:[#allocation0] sm:$0x3]  }
  0x1e   :  { %v179_v22 = vld [vmem:[#allocation0] sm:$0x3]  }
  0x1f   :  { %v187_v23 = vld [vmem:[#allocation0] sm:$0x3]  }
  0x20   :  { %v195_v24 = vld [vmem:[#allocation0] sm:$0x3]  }
  0x21   :  { %v203_v25 = vld [vmem:[#allocation0] sm:$0x3]  }
  0x22   :  { %84 = vrot.lane.b32.xlu0 %v83_v10, %s362_s16  ;;  %v211_v26 = vld [vmem:[#allocation0] sm:$0x3]  }
  0x23   :  { %92 = vrot.lane.b32.xlu1 %v91_v11, %s363_s17  ;;  %v219_v27 = vld [vmem:[#allocation0] sm:$0x3]  }
  0x24   :  { %100 = vrot.lane.b32.xlu2 %v99_v12, %s364_s18  ;;  %v227_v28 = vld [vmem:[#allocation0] sm:$0x3]  }
  0x25   :  { %v235_v29 = vld [vmem:[#allocation0] sm:$0x3]  }
  0x26   :  { %v243_v30 = vld [vmem:[#allocation0] sm:$0x3]  }
  0x27   :  { %v251_v31 = vld [vmem:[#allocation0] sm:$0x3]  }
  0x28   :  { %v6_v56 = vld [vmem:[#allocation0] sm:$0x3]  }
  0x29   :  { %8 = vst.msk [vmem:[%s654_s1] sm:$0x1] %vm7_vm0, %v6_v56  }
  0x2a   :  { %108 = vrot.lane.b32.xlu0 %v107_v13, %s365_s19  ;;  %259 = vst.msk [vmem:[%s654_s1 + $0x1f] sm:$0x2] %vm7_vm0, %v6_v56  }
  0x2b   :  { %116 = vrot.lane.b32.xlu1 %v115_v14, %s366_s20 }
  0x2c   :  { %124 = vrot.lane.b32.xlu2 %v123_v15, %s367_s21 }
  0x32   :  { %132 = vrot.lane.b32.xlu0 %v131_v16, %s368_s22 }
  0x33   :  { %140 = vrot.lane.b32.xlu1 %v139_v17, %s369_s23 }
  0x34   :  { %148 = vrot.lane.b32.xlu2 %v147_v18, %s370_s24 }
  0x3a   :  { %156 = vrot.lane.b32.xlu0 %v155_v19, %s371_s25 }
  0x3b   :  { %164 = vrot.lane.b32.xlu1 %v163_v20, %s372_s26 }
  0x3c   :  { %172 = vrot.lane.b32.xlu2 %v171_v21, %s373_s27 }
  0x42   :  { %180 = vrot.lane.b32.xlu0 %v179_v22, %s374_s28 }
  0x43   :  { %188 = vrot.lane.b32.xlu1 %v187_v23, %s375_s29 }
  0x44   :  { %196 = vrot.lane.b32.xlu2 %v195_v24, %s376_s30 }
  0x4a   :  { %204 = vrot.lane.b32.xlu0 %v203_v25, %s377_s2 }
  0x4b   :  { %212 = vrot.lane.b32.xlu1 %v211_v26, %s378_s3 }
  0x4c   :  { %220 = vrot.lane.b32.xlu2 %v219_v27, %s379_s4 }
  0x52   :  { %228 = vrot.lane.b32.xlu0 %v227_v28, %s380_s5 }
  0x53   :  { %236 = vrot.lane.b32.xlu1 %v235_v29, %s381_s6 }
  0x54   :  { %244 = vrot.lane.b32.xlu2 %v243_v30, %s382_s7 }
  0x5a   :  { %252 = vrot.lane.b32.xlu0 %v251_v31, %s383_s0 }
  0x66   :  { %v45_v32 = vpop.permute.xlu2 %44  }
  0x67   :  { %268 = vst.msk [vmem:[%s654_s1 + $0x5] sm:$0x1] %vm7_vm0, %v45_v32  }
  0x68   :  { %269 = vst.msk [vmem:[%s654_s1 + $0x24] sm:$0x2] %vm7_vm0, %v45_v32  }
  0x6e   :  { %v53_v33 = vpop.permute.xlu2 %52  }
  0x6f   :  { %270 = vst.msk [vmem:[%s654_s1 + $0x6] sm:$0x1] %vm7_vm0, %v53_v33  }
  0x70   :  { %271 = vst.msk [vmem:[%s654_s1 + $0x25] sm:$0x2] %vm7_vm0, %v53_v33  }
  0x76   :  { %v77_v34 = vpop.permute.xlu2 %76  }
  0x77   :  { %276 = vst.msk [vmem:[%s654_s1 + $0x9] sm:$0x1] %vm7_vm0, %v77_v34  }
  0x78   :  { %277 = vst.msk [vmem:[%s654_s1 + $0x28] sm:$0x2] %vm7_vm0, %v77_v34  }
  0x7c   :  { %v13_v35 = vpop.permute.xlu0 %12  }
  0x7d   :  { %v29_v36 = vpop.permute.xlu1 %28   ;;  %260 = vst.msk [vmem:[%s654_s1 + $0x1] sm:$0x1] %vm7_vm0, %v13_v35  }
  0x7e   :  { %261 = vst.msk [vmem:[%s654_s1 + $0x20] sm:$0x2] %vm7_vm0, %v13_v35   ;;  %v101_v37 = vpop.permute.xlu2 %100  }
  0x7f   :  { %264 = vst.msk [vmem:[%s654_s1 + $0x3] sm:$0x1] %vm7_vm0, %v29_v36  }
  0x80   :  { %265 = vst.msk [vmem:[%s654_s1 + $0x22] sm:$0x2] %vm7_vm0, %v29_v36  }
  0x81   :  { %282 = vst.msk [vmem:[%s654_s1 + $0xc] sm:$0x1] %vm7_vm0, %v101_v37  }
  0x82   :  { %283 = vst.msk [vmem:[%s654_s1 + $0x2b] sm:$0x2] %vm7_vm0, %v101_v37  }
  0x84   :  { %v21_v38 = vpop.permute.xlu0 %20  }
  0x85   :  { %v37_v39 = vpop.permute.xlu1 %36   ;;  %262 = vst.msk [vmem:[%s654_s1 + $0x2] sm:$0x1] %vm7_vm0, %v21_v38  }
  0x86   :  { %263 = vst.msk [vmem:[%s654_s1 + $0x21] sm:$0x2] %vm7_vm0, %v21_v38   ;;  %v125_v40 = vpop.permute.xlu2 %124  }
  0x87   :  { %266 = vst.msk [vmem:[%s654_s1 + $0x4] sm:$0x1] %vm7_vm0, %v37_v39  }
  0x88   :  { %267 = vst.msk [vmem:[%s654_s1 + $0x23] sm:$0x2] %vm7_vm0, %v37_v39  }
  0x89   :  { %288 = vst.msk [vmem:[%s654_s1 + $0xf] sm:$0x1] %vm7_vm0, %v125_v40  }
  0x8a   :  { %289 = vst.msk [vmem:[%s654_s1 + $0x2e] sm:$0x2] %vm7_vm0, %v125_v40  }
  0x8c   :  { %v61_v41 = vpop.permute.xlu0 %60  }
  0x8d   :  { %v69_v42 = vpop.permute.xlu1 %68   ;;  %272 = vst.msk [vmem:[%s654_s1 + $0x7] sm:$0x1] %vm7_vm0, %v61_v41  }
  0x8e   :  { %273 = vst.msk [vmem:[%s654_s1 + $0x26] sm:$0x2] %vm7_vm0, %v61_v41   ;;  %v149_v43 = vpop.permute.xlu2 %148  }
  0x8f   :  { %274 = vst.msk [vmem:[%s654_s1 + $0x8] sm:$0x1] %vm7_vm0, %v69_v42  }
  0x90   :  { %275 = vst.msk [vmem:[%s654_s1 + $0x27] sm:$0x2] %vm7_vm0, %v69_v42  }
  0x91   :  { %294 = vst.msk [vmem:[%s654_s1 + $0x12] sm:$0x1] %vm7_vm0, %v149_v43  }
  0x92   :  { %295 = vst.msk [vmem:[%s654_s1 + $0x31] sm:$0x2] %vm7_vm0, %v149_v43  }
  0x94   :  { %v85_v44 = vpop.permute.xlu0 %84  }
  0x95   :  { %v93_v45 = vpop.permute.xlu1 %92   ;;  %278 = vst.msk [vmem:[%s654_s1 + $0xa] sm:$0x1] %vm7_vm0, %v85_v44  }
  0x96   :  { %279 = vst.msk [vmem:[%s654_s1 + $0x29] sm:$0x2] %vm7_vm0, %v85_v44   ;;  %v173_v46 = vpop.permute.xlu2 %172  }
  0x97   :  { %280 = vst.msk [vmem:[%s654_s1 + $0xb] sm:$0x1] %vm7_vm0, %v93_v45  }
  0x98   :  { %281 = vst.msk [vmem:[%s654_s1 + $0x2a] sm:$0x2] %vm7_vm0, %v93_v45  }
  0x99   :  { %300 = vst.msk [vmem:[%s654_s1 + $0x15] sm:$0x1] %vm7_vm0, %v173_v46  }
  0x9a   :  { %301 = vst.msk [vmem:[%s654_s1 + $0x34] sm:$0x2] %vm7_vm0, %v173_v46  }
  0x9c   :  { %v109_v47 = vpop.permute.xlu0 %108  }
  0x9d   :  { %v117_v48 = vpop.permute.xlu1 %116   ;;  %284 = vst.msk [vmem:[%s654_s1 + $0xd] sm:$0x1] %vm7_vm0, %v109_v47  }
  0x9e   :  { %285 = vst.msk [vmem:[%s654_s1 + $0x2c] sm:$0x2] %vm7_vm0, %v109_v47   ;;  %v197_v49 = vpop.permute.xlu2 %196  }
  0x9f   :  { %286 = vst.msk [vmem:[%s654_s1 + $0xe] sm:$0x1] %vm7_vm0, %v117_v48  }
  0xa0   :  { %287 = vst.msk [vmem:[%s654_s1 + $0x2d] sm:$0x2] %vm7_vm0, %v117_v48  }
  0xa1   :  { %306 = vst.msk [vmem:[%s654_s1 + $0x18] sm:$0x1] %vm7_vm0, %v197_v49  }
  0xa2   :  { %307 = vst.msk [vmem:[%s654_s1 + $0x37] sm:$0x2] %vm7_vm0, %v197_v49  }
  0xa4   :  { %v133_v50 = vpop.permute.xlu0 %132  }
  0xa5   :  { %v141_v51 = vpop.permute.xlu1 %140   ;;  %290 = vst.msk [vmem:[%s654_s1 + $0x10] sm:$0x1] %vm7_vm0, %v133_v50  }
  0xa6   :  { %291 = vst.msk [vmem:[%s654_s1 + $0x2f] sm:$0x2] %vm7_vm0, %v133_v50   ;;  %v221_v52 = vpop.permute.xlu2 %220  }
  0xa7   :  { %292 = vst.msk [vmem:[%s654_s1 + $0x11] sm:$0x1] %vm7_vm0, %v141_v51  }
  0xa8   :  { %293 = vst.msk [vmem:[%s654_s1 + $0x30] sm:$0x2] %vm7_vm0, %v141_v51  }
  0xa9   :  { %312 = vst.msk [vmem:[%s654_s1 + $0x1b] sm:$0x1] %vm7_vm0, %v221_v52  }
  0xaa   :  { %313 = vst.msk [vmem:[%s654_s1 + $0x3a] sm:$0x2] %vm7_vm0, %v221_v52  }
  0xac   :  { %v157_v53 = vpop.permute.xlu0 %156  }
  0xad   :  { %v165_v54 = vpop.permute.xlu1 %164   ;;  %296 = vst.msk [vmem:[%s654_s1 + $0x13] sm:$0x1] %vm7_vm0, %v157_v53  }
  0xae   :  { %297 = vst.msk [vmem:[%s654_s1 + $0x32] sm:$0x2] %vm7_vm0, %v157_v53   ;;  %v245_v55 = vpop.permute.xlu2 %244  }
  0xaf   :  { %298 = vst.msk [vmem:[%s654_s1 + $0x14] sm:$0x1] %vm7_vm0, %v165_v54  }
  0xb0   :  { %299 = vst.msk [vmem:[%s654_s1 + $0x33] sm:$0x2] %vm7_vm0, %v165_v54  }
  0xb1   :  { %318 = vst.msk [vmem:[%s654_s1 + $0x1e] sm:$0x1] %vm7_vm0, %v245_v55  }
  0xb2   :  { %319 = vst.msk [vmem:[%s654_s1 + $0x3d] sm:$0x2] %vm7_vm0, %v245_v55  }
  0xb4   :  { %v181_v57 = vpop.permute.xlu0 %180  }
  0xb5   :  { %v189_v58 = vpop.permute.xlu1 %188   ;;  %302 = vst.msk [vmem:[%s654_s1 + $0x16] sm:$0x1] %vm7_vm0, %v181_v57  }
  0xb6   :  { %303 = vst.msk [vmem:[%s654_s1 + $0x35] sm:$0x2] %vm7_vm0, %v181_v57  }
  0xb7   :  { %304 = vst.msk [vmem:[%s654_s1 + $0x17] sm:$0x1] %vm7_vm0, %v189_v58  }
  0xb8   :  { %305 = vst.msk [vmem:[%s654_s1 + $0x36] sm:$0x2] %vm7_vm0, %v189_v58  }
  0xbc   :  { %v205_v59 = vpop.permute.xlu0 %204  }
  0xbd   :  { %v213_v60 = vpop.permute.xlu1 %212   ;;  %308 = vst.msk [vmem:[%s654_s1 + $0x19] sm:$0x1] %vm7_vm0, %v205_v59  }
  0xbe   :  { %309 = vst.msk [vmem:[%s654_s1 + $0x38] sm:$0x2] %vm7_vm0, %v205_v59  }
  0xbf   :  { %310 = vst.msk [vmem:[%s654_s1 + $0x1a] sm:$0x1] %vm7_vm0, %v213_v60  }
  0xc0   :  { %311 = vst.msk [vmem:[%s654_s1 + $0x39] sm:$0x2] %vm7_vm0, %v213_v60  }
  0xc4   :  { %v229_v61 = vpop.permute.xlu0 %228  }
  0xc5   :  { %v237_v62 = vpop.permute.xlu1 %236   ;;  %314 = vst.msk [vmem:[%s654_s1 + $0x1c] sm:$0x1] %vm7_vm0, %v229_v61  }
  0xc6   :  { %315 = vst.msk [vmem:[%s654_s1 + $0x3b] sm:$0x2] %vm7_vm0, %v229_v61  }
  0xc7   :  { %316 = vst.msk [vmem:[%s654_s1 + $0x1d] sm:$0x1] %vm7_vm0, %v237_v62  }
  0xc8   :  { %317 = vst.msk [vmem:[%s654_s1 + $0x3c] sm:$0x2] %vm7_vm0, %v237_v62  }
  0xcc   :  { %v253_v63 = vpop.permute.xlu0 %252  }
  0xcd   :  { %320 = vst.msk [vmem:[%s654_s1 + $0x1f] sm:$0x1] %vm7_vm0, %v253_v63  }
  0xce   :  { %321 = vst.msk [vmem:[%s654_s1 + $0x3e] sm:$0x2] %vm7_vm0, %v253_v63  }

// kernel: semantic_attention.2
= control target key start
LH: loop header
LB: loop body
LE: loop exit
PB: predicated region body
PF: predicated region fallthrough
CT: control target
= control target key end

     0   :  { %9 = vsyncpa [#allocation3], 0  ;;  %s874_s0 = inlined_call_operand.hbm [shape: f32[256,128], index: 0, kind: input, shape index: {}]   ;;  %s875_s1 = inlined_call_operand.hbm [shape: f32[128,128], index: 1, kind: input, shape index: {}]   ;;  %s876_s2 = inlined_call_operand.hbm [shape: f32[1,128], index: 2, kind: input, shape index: {}]   ;;  %s877_s3 = inlined_call_operand.hbm [shape: f32[1,128], index: 3, kind: input, shape index: {}]   ;;  %s878_s4 = inlined_call_operand.vmem [shape: f32[256,1], index: 4, kind: output, shape index: {}]  }
   0x1   :  { %10 = vsyncpa [#allocation5], 0 }
   0x2   :  { %11 = vsyncpa [#allocation8], 0  ;;  %s29_s17 = sshll.u32 %s875_s1, 4  ;;  %s635_s18 = smov [#allocation4]   ;;  %s30_s17 = int_to_ptr.hbm [resolvable:$true] %s29_s17 }
   0x3   :  { %s31_s19 = sshll.u32 %s635_s18, 4  ;;  %s16_s22 = sshll.u32 %s874_s0, 4  ;;  %s32_s19 = int_to_ptr.vmem [resolvable:$true] %s31_s19  ;;  %s17_s22 = int_to_ptr.hbm [resolvable:$true] %s16_s22 }
   0x4   :  { %s636_s23 = smov 128   ;;  %s637_s24 = smov 8  }
   0x5   :  { %37 = dma.hbm_to_vmem [thread:$0]  %s30_s17, 2048, %s32_s19, [#allocation5], %s636_s23, %s636_s23, %s637_s24  }
   0x6   :  { %s638_s25 = smov [#allocation2]   ;;  %s43_s29 = sshll.u32 %s876_s2, 4  ;;  %s44_s29 = int_to_ptr.hbm [resolvable:$true] %s43_s29 }
   0x7   :  { %s18_s26 = sshll.u32 %s638_s25, 4  ;;  %s54_s5 = sshll.u32 %s877_s3, 4  ;;  %s19_s26 = int_to_ptr.vmem [resolvable:$true] %s18_s26  ;;  %s55_s5 = int_to_ptr.hbm [resolvable:$true] %s54_s5 }
   0x8   :  { %24 = dma.hbm_to_vmem [thread:$0]  %s17_s22, 4096, %s19_s26, [#allocation3], %s636_s23, %s636_s23, %s637_s24  }
   0x9   :  { %s639_s6 = smov [#allocation6]   ;;  %s640_s0 = smov [#allocation7]  }
   0xa   :  { %s45_s7 = sshll.u32 %s639_s6, 4  ;;  %s56_s8 = sshll.u32 %s640_s0, 4  ;;  %s46_s7 = int_to_ptr.vmem [resolvable:$true] %s45_s7  ;;  %s57_s8 = int_to_ptr.vmem [resolvable:$true] %s56_s8 }
   0xb   :  { %48 = dma.hbm_to_vmem [thread:$0]  %s44_s29, 16, %s46_s7, [#allocation5]  }
   0xc   :  { %59 = dma.hbm_to_vmem [thread:$0]  %s55_s5, 16, %s57_s8, [#allocation8]  }
   0xd   :  { %629 = dma.done.wait [#allocation3], 4096  }
   0xe   :  { %630 = vsyncadd [#allocation3], 4294963200 }
   0xf   :  { %631 = dma.done.wait [#allocation5], 2064  }
  0x10   :  { %632 = vsyncadd [#allocation5], 4294965232 }
  0x11   :  { %633 = dma.done.wait [#allocation8], 16  }
  0x12   :  { %634 = vsyncadd [#allocation8], 4294967280  ;;  %v123_v0 = vld [vmem:[#allocation4 + $0x78] sm:$0xff]  ;;  %v122_v1 = vld [vmem:[#allocation4 + $0x70] sm:$0xff]  ;;  %vm373_vm0 = vcmask 7168  }
  0x13   :  { %128 = vmatpush.msra.mxu0 %v123_v0  ;;  %414 = vmatpush.msra.mxu2 %v123_v0  ;;  %v121_v2 = vld [vmem:[#allocation4 + $0x68] sm:$0xff]  ;;  %v120_v3 = vld [vmem:[#allocation4 + $0x60] sm:$0xff]  ;;  %v119_v4 = vld [vmem:[#allocation4 + $0x58] sm:$0xff] }
  0x14   :  { %415 = vmatpush.msra.mxu3 %v123_v0  ;;  %413 = vmatpush.msra.mxu1 %v123_v0  ;;  %v118_v5 = vld [vmem:[#allocation4 + $0x50] sm:$0xff]  ;;  %v117_v6 = vld [vmem:[#allocation4 + $0x48] sm:$0xff]  ;;  %v116_v7 = vld [vmem:[#allocation4 + $0x40] sm:$0xff] }
  0x15   :  { %129 = vmatpush.msra.mxu0 %v122_v1  ;;  %417 = vmatpush.msra.mxu2 %v122_v1  ;;  %v115_v8 = vld [vmem:[#allocation4 + $0x38] sm:$0xff]  ;;  %v114_v9 = vld [vmem:[#allocation4 + $0x30] sm:$0xff]  ;;  %v113_v10 = vld [vmem:[#allocation4 + $0x28] sm:$0xff] }
  0x16   :  { %418 = vmatpush.msra.mxu3 %v122_v1  ;;  %416 = vmatpush.msra.mxu1 %v122_v1  ;;  %v112_v11 = vld [vmem:[#allocation4 + $0x20] sm:$0xff]  ;;  %v111_v12 = vld [vmem:[#allocation4 + $0x18] sm:$0xff]  ;;  %v110_v13 = vld [vmem:[#allocation4 + $0x10] sm:$0xff] }
  0x17   :  { %130 = vmatpush.msra.mxu0 %v121_v2  ;;  %420 = vmatpush.msra.mxu2 %v121_v2  ;;  %v109_v14 = vld [vmem:[#allocation4 + $0x8] sm:$0xff]  ;;  %v108_v15 = vld [vmem:[#allocation4] sm:$0xff]  ;;  %v78_v24 = vld [vmem:[#allocation2 + $0x10] sm:$0xff] }
  0x18   :  { %421 = vmatpush.msra.mxu3 %v121_v2  ;;  %419 = vmatpush.msra.mxu1 %v121_v2  ;;  %v76_v16 = vld [vmem:[#allocation2] sm:$0xff]  ;;  %v77_v20 = vld [vmem:[#allocation2 + $0x8] sm:$0xff]  ;;  %v102_v25 = vld [vmem:[#allocation2 + $0xd0] sm:$0xff] }
  0x19   :  { %131 = vmatpush.msra.mxu0 %v120_v3  ;;  %423 = vmatpush.msra.mxu2 %v120_v3  ;;  %v92_v17 = vld [vmem:[#allocation2 + $0x80] sm:$0xff]  ;;  %v93_v21 = vld [vmem:[#allocation2 + $0x88] sm:$0xff]  ;;  %v94_v26 = vld [vmem:[#allocation2 + $0x90] sm:$0xff] }
  0x1a   :  { %424 = vmatpush.msra.mxu3 %v120_v3  ;;  %422 = vmatpush.msra.mxu1 %v120_v3  ;;  %v100_v18 = vld [vmem:[#allocation2 + $0xc0] sm:$0xff]  ;;  %v101_v22 = vld [vmem:[#allocation2 + $0xc8] sm:$0xff]  ;;  %v86_v27 = vld [vmem:[#allocation2 + $0x50] sm:$0xff] }
  0x1b   :  { %132 = vmatpush.msra.mxu0 %v119_v4  ;;  %426 = vmatpush.msra.mxu2 %v119_v4  ;;  %v84_v19 = vld [vmem:[#allocation2 + $0x40] sm:$0xff]  ;;  %v85_v23 = vld [vmem:[#allocation2 + $0x48] sm:$0xff]  ;;  %v79_v28 = vld [vmem:[#allocation2 + $0x18] sm:$0xff] }
  0x1c   :  { %427 = vmatpush.msra.mxu3 %v119_v4  ;;  %425 = vmatpush.msra.mxu1 %v119_v4  ;;  %v95_v29 = vld [vmem:[#allocation2 + $0x98] sm:$0xff]  ;;  %v80_v32 = vld [vmem:[#allocation2 + $0x20] sm:$0xff]  ;;  %v81_v36 = vld [vmem:[#allocation2 + $0x28] sm:$0xff] }
  0x1d   :  { %133 = vmatpush.msra.mxu0 %v118_v5  ;;  %429 = vmatpush.msra.mxu2 %v118_v5  ;;  %v103_v30 = vld [vmem:[#allocation2 + $0xd8] sm:$0xff]  ;;  %v96_v33 = vld [vmem:[#allocation2 + $0xa0] sm:$0xff]  ;;  %v97_v37 = vld [vmem:[#allocation2 + $0xa8] sm:$0xff] }
  0x1e   :  { %430 = vmatpush.msra.mxu3 %v118_v5  ;;  %428 = vmatpush.msra.mxu1 %v118_v5  ;;  %v87_v31 = vld [vmem:[#allocation2 + $0x58] sm:$0xff]  ;;  %v104_v34 = vld [vmem:[#allocation2 + $0xe0] sm:$0xff]  ;;  %v105_v38 = vld [vmem:[#allocation2 + $0xe8] sm:$0xff] }
  0x1f   :  { %134 = vmatpush.msra.mxu0 %v117_v6  ;;  %432 = vmatpush.msra.mxu2 %v117_v6  ;;  %v88_v35 = vld [vmem:[#allocation2 + $0x60] sm:$0xff]  ;;  %v89_v39 = vld [vmem:[#allocation2 + $0x68] sm:$0xff]  ;;  %v82_v40 = vld [vmem:[#allocation2 + $0x30] sm:$0xff] }
  0x20   :  { %433 = vmatpush.msra.mxu3 %v117_v6  ;;  %431 = vmatpush.msra.mxu1 %v117_v6  ;;  %v98_v41 = vld [vmem:[#allocation2 + $0xb0] sm:$0xff]  ;;  %v83_v44 = vld [vmem:[#allocation2 + $0x38] sm:$0xff]  ;;  %v678_v48 = vld [vmem:[#allocation6] ss:$0 sm:$0xff] }
  0x21   :  { %135 = vmatpush.msra.mxu0 %v116_v7  ;;  %435 = vmatpush.msra.mxu2 %v116_v7  ;;  %v106_v42 = vld [vmem:[#allocation2 + $0xf0] sm:$0xff]  ;;  %v99_v45 = vld [vmem:[#allocation2 + $0xb8] sm:$0xff]  ;;  %v682_v53 = vld [vmem:[#allocation7] ss:$0 sm:$0xff] }
  0x22   :  { %436 = vmatpush.msra.mxu3 %v116_v7  ;;  %434 = vmatpush.msra.mxu1 %v116_v7  ;;  %v90_v43 = vld [vmem:[#allocation2 + $0x70] sm:$0xff]  ;;  %v107_v46 = vld [vmem:[#allocation2 + $0xf8] sm:$0xff] }
  0x23   :  { %136 = vmatpush.msra.mxu0 %v115_v8  ;;  %438 = vmatpush.msra.mxu2 %v115_v8  ;;  %v91_v47 = vld [vmem:[#allocation2 + $0x78] sm:$0xff] }
  0x24   :  { %439 = vmatpush.msra.mxu3 %v115_v8  ;;  %437 = vmatpush.msra.mxu1 %v115_v8 }
  0x25   :  { %137 = vmatpush.msra.mxu0 %v114_v9  ;;  %441 = vmatpush.msra.mxu2 %v114_v9 }
  0x26   :  { %442 = vmatpush.msra.mxu3 %v114_v9  ;;  %440 = vmatpush.msra.mxu1 %v114_v9 }
  0x27   :  { %138 = vmatpush.msra.mxu0 %v113_v10  ;;  %444 = vmatpush.msra.mxu2 %v113_v10 }
  0x28   :  { %445 = vmatpush.msra.mxu3 %v113_v10  ;;  %443 = vmatpush.msra.mxu1 %v113_v10 }
  0x29   :  { %139 = vmatpush.msra.mxu0 %v112_v11  ;;  %447 = vmatpush.msra.mxu2 %v112_v11 }
  0x2a   :  { %448 = vmatpush.msra.mxu3 %v112_v11  ;;  %446 = vmatpush.msra.mxu1 %v112_v11 }
  0x2b   :  { %140 = vmatpush.msra.mxu0 %v111_v12  ;;  %450 = vmatpush.msra.mxu2 %v111_v12 }
  0x2c   :  { %451 = vmatpush.msra.mxu3 %v111_v12  ;;  %449 = vmatpush.msra.mxu1 %v111_v12 }
  0x2d   :  { %141 = vmatpush.msra.mxu0 %v110_v13  ;;  %453 = vmatpush.msra.mxu2 %v110_v13 }
  0x2e   :  { %454 = vmatpush.msra.mxu3 %v110_v13  ;;  %452 = vmatpush.msra.mxu1 %v110_v13 }
  0x2f   :  { %142 = vmatpush.msra.mxu0 %v109_v14  ;;  %456 = vmatpush.msra.mxu2 %v109_v14 }
  0x30   :  { %457 = vmatpush.msra.mxu3 %v109_v14  ;;  %455 = vmatpush.msra.mxu1 %v109_v14 }
  0x31   :  { %143 = vmatpush.msra.mxu0 %v108_v15  ;;  %459 = vmatpush.msra.mxu2 %v108_v15 }
  0x32   :  { %460 = vmatpush.msra.mxu3 %v108_v15  ;;  %144 = vmatmul.f32.vlgmr.msra.gmra.mxu0 %v76_v16 }
  0x33   :  { %192 = vmatmul.f32.vlgmr.msra.gmra.mxu2 %v92_v17  ;;  %216 = vmatmul.f32.vlgmr.msra.gmra.mxu3 %v100_v18 }
  0x34   :  { %458 = vmatpush.msra.mxu1 %v108_v15 }
  0x35   :  { %168 = vmatmul.f32.vlgmr.msra.gmra.mxu1 %v84_v19 }
  0x3a   :  { %147 = vmatmul.f32.gmra.mxu0 %v77_v20 }
  0x3b   :  { %195 = vmatmul.f32.gmra.mxu2 %v93_v21  ;;  %219 = vmatmul.f32.gmra.mxu3 %v101_v22 }
  0x3d   :  { %171 = vmatmul.f32.gmra.mxu1 %v85_v23 }
  0x42   :  { %150 = vmatmul.f32.gmra.mxu0 %v78_v24 }
  0x43   :  { %222 = vmatmul.f32.gmra.mxu3 %v102_v25  ;;  %198 = vmatmul.f32.gmra.mxu2 %v94_v26 }
  0x45   :  { %174 = vmatmul.f32.gmra.mxu1 %v86_v27 }
  0x4a   :  { %153 = vmatmul.f32.gmra.mxu0 %v79_v28 }
  0x4b   :  { %201 = vmatmul.f32.gmra.mxu2 %v95_v29  ;;  %225 = vmatmul.f32.gmra.mxu3 %v103_v30 }
  0x4d   :  { %177 = vmatmul.f32.gmra.mxu1 %v87_v31 }
  0x52   :  { %156 = vmatmul.f32.gmra.mxu0 %v80_v32 }
  0x53   :  { %204 = vmatmul.f32.gmra.mxu2 %v96_v33  ;;  %228 = vmatmul.f32.gmra.mxu3 %v104_v34 }
  0x55   :  { %180 = vmatmul.f32.gmra.mxu1 %v88_v35 }
  0x5a   :  { %159 = vmatmul.f32.gmra.mxu0 %v81_v36 }
  0x5b   :  { %207 = vmatmul.f32.gmra.mxu2 %v97_v37  ;;  %231 = vmatmul.f32.gmra.mxu3 %v105_v38 }
  0x5d   :  { %183 = vmatmul.f32.gmra.mxu1 %v89_v39 }
  0x62   :  { %162 = vmatmul.f32.gmra.mxu0 %v82_v40 }
  0x63   :  { %210 = vmatmul.f32.gmra.mxu2 %v98_v41  ;;  %234 = vmatmul.f32.gmra.mxu3 %v106_v42 }
  0x65   :  { %186 = vmatmul.f32.gmra.mxu1 %v90_v43 }
  0x6a   :  { %165 = vmatmul.f32.gmra.mxu0 %v83_v44 }
  0x6b   :  { %213 = vmatmul.f32.gmra.mxu2 %v99_v45  ;;  %237 = vmatmul.f32.gmra.mxu3 %v107_v46 }
  0x6d   :  { %189 = vmatmul.f32.gmra.mxu1 %v91_v47 }
  0xaf   :  { %v145_v49 = vpop.f32.mrf.mxu0 }
  0xb0   :  { %v146_v50 = vadd.f32 %v678_v48, %v145_v49 }
  0xb2   :  { %469 = vtanh.f32 %v146_v50  ;;  %v169_v51 = vpop.f32.mrf.mxu1 }
  0xb3   :  { %v170_v52 = vadd.f32 %v678_v48, %v169_v51 }
  0xb5   :  { %471 = vtanh.f32 %v170_v52 }
  0xb6   :  { %v193_v54 = vpop.f32.mrf.mxu2  ;;  %v217_v55 = vpop.f32.mrf.mxu3 }
  0xb7   :  { %v194_v56 = vadd.f32 %v678_v48, %v193_v54  ;;  %v218_v57 = vadd.f32 %v678_v48, %v217_v55  ;;  %v148_v58 = vpop.f32.mrf.mxu0 }
  0xb8   :  { %v470_v59 = vpop.eup %469  ;;  %v149_v63 = vadd.f32 %v678_v48, %v148_v58 }
  0xb9   :  { %473 = vtanh.f32 %v194_v56  ;;  %v277_v60 = vmul.f32 %v470_v59, %v682_v53 }
  0xba   :  { %475 = vtanh.f32 %v218_v57  ;;  %v172_v61 = vpop.f32.mrf.mxu1 }
  0xbb   :  { %v472_v62 = vpop.eup %471  ;;  %309 = vadd.xlane.f32.xlu0 %v277_v60  ;;  %477 = vtanh.f32 %v149_v63  ;;  %v173_v12 = vadd.f32 %v678_v48, %v172_v61 }
  0xbc   :  { %v285_v0 = vmul.f32 %v472_v62, %v682_v53 }
  0xbe   :  { %v196_v1 = vpop.f32.mrf.mxu2  ;;  %v220_v2 = vpop.f32.mrf.mxu3  ;;  %325 = vadd.xlane.f32.xlu2 %v285_v0 }
  0xbf   :  { %v474_v3 = vpop.eup %473  ;;  %v197_v4 = vadd.f32 %v678_v48, %v196_v1  ;;  %v221_v5 = vadd.f32 %v678_v48, %v220_v2  ;;  %v151_v6 = vpop.f32.mrf.mxu0 }
  0xc0   :  { %v476_v7 = vpop.eup %475  ;;  %v293_v8 = vmul.f32 %v474_v3, %v682_v53  ;;  %v152_v10 = vadd.f32 %v678_v48, %v151_v6 }
  0xc1   :  { %479 = vtanh.f32 %v197_v4  ;;  %v301_v9 = vmul.f32 %v476_v7, %v682_v53  ;;  %v478_v13 = vpop.eup %477 }
  0xc2   :  { %481 = vtanh.f32 %v221_v5  ;;  %341 = vadd.xlane.f32.xlu1 %v293_v8  ;;  %v175_v11 = vpop.f32.mrf.mxu1  ;;  %v278_v23 = vmul.f32 %v478_v13, %v682_v53 }
  0xc3   :  { %357 = vadd.xlane.f32.xlu0 %v301_v9  ;;  %483 = vtanh.f32 %v152_v10  ;;  %v176_v20 = vadd.f32 %v678_v48, %v175_v11 }
  0xc4   :  { %485 = vtanh.f32 %v173_v12 }
  0xc6   :  { %v223_v14 = vpop.f32.mrf.mxu3  ;;  %v199_v15 = vpop.f32.mrf.mxu2 }
  0xc7   :  { %v480_v16 = vpop.eup %479  ;;  %v224_v17 = vadd.f32 %v678_v48, %v223_v14  ;;  %v154_v18 = vpop.f32.mrf.mxu0  ;;  %v200_v25 = vadd.f32 %v678_v48, %v199_v15 }
  0xc8   :  { %v482_v19 = vpop.eup %481  ;;  %v294_v21 = vmul.f32 %v480_v16, %v682_v53  ;;  %v155_v34 = vadd.f32 %v678_v48, %v154_v18 }
  0xc9   :  { %487 = vtanh.f32 %v224_v17  ;;  %v302_v22 = vmul.f32 %v482_v19, %v682_v53  ;;  %v484_v27 = vpop.eup %483 }
  0xca   :  { %343 = vadd.xlane.f32.xlu2 %v294_v21  ;;  %v178_v24 = vpop.f32.mrf.mxu1  ;;  %489 = vtanh.f32 %v176_v20  ;;  %v486_v28 = vpop.eup %485  ;;  %v279_v32 = vmul.f32 %v484_v27, %v682_v53 }
  0xcb   :  { %359 = vadd.xlane.f32.xlu1 %v302_v22  ;;  %311 = vadd.xlane.f32.xlu0 %v278_v23  ;;  %v179_v26 = vadd.f32 %v678_v48, %v178_v24  ;;  %v286_v36 = vmul.f32 %v486_v28, %v682_v53 }
  0xcd   :  { %491 = vtanh.f32 %v179_v26 }
  0xce   :  { %493 = vtanh.f32 %v200_v25  ;;  %v202_v29 = vpop.f32.mrf.mxu2  ;;  %v226_v30 = vpop.f32.mrf.mxu3 }
  0xcf   :  { %v488_v31 = vpop.eup %487  ;;  %v157_v33 = vpop.f32.mrf.mxu0  ;;  %v227_v39 = vadd.f32 %v678_v48, %v226_v30  ;;  %495 = vtanh.f32 %v155_v34  ;;  %v203_v46 = vadd.f32 %v678_v48, %v202_v29 }
  0xd0   :  { %v303_v35 = vmul.f32 %v488_v31, %v682_v53  ;;  %v158_v37 = vadd.f32 %v678_v48, %v157_v33  ;;  %v490_v38 = vpop.eup %489 }
  0xd1   :  { %v287_v47 = vmul.f32 %v490_v38, %v682_v53 }
  0xd2   :  { %361 = vadd.xlane.f32.xlu2 %v303_v35  ;;  %v181_v40 = vpop.f32.mrf.mxu1  ;;  %497 = vtanh.f32 %v158_v37 }
  0xd3   :  { %v492_v41 = vpop.eup %491  ;;  %313 = vadd.xlane.f32.xlu1 %v279_v32  ;;  %327 = vadd.xlane.f32.xlu0 %v286_v36  ;;  %499 = vtanh.f32 %v227_v39  ;;  %v182_v54 = vadd.f32 %v678_v48, %v181_v40 }
  0xd4   :  { %v494_v42 = vpop.eup %493  ;;  %v288_v43 = vmul.f32 %v492_v41, %v682_v53  ;;  %501 = vtanh.f32 %v203_v46 }
  0xd5   :  { %v295_v49 = vmul.f32 %v494_v42, %v682_v53  ;;  %v496_v52 = vpop.eup %495 }
  0xd6   :  { %v205_v44 = vpop.f32.mrf.mxu2  ;;  %v229_v45 = vpop.f32.mrf.mxu3  ;;  %v280_v63 = vmul.f32 %v496_v52, %v682_v53 }
  0xd7   :  { %v160_v50 = vpop.f32.mrf.mxu0  ;;  %v206_v51 = vadd.f32 %v678_v48, %v205_v44  ;;  %v230_v3 = vadd.f32 %v678_v48, %v229_v45 }
  0xd8   :  { %v498_v56 = vpop.eup %497  ;;  %v161_v59 = vadd.f32 %v678_v48, %v160_v50 }
  0xd9   :  { %v500_v58 = vpop.eup %499  ;;  %503 = vtanh.f32 %v206_v51  ;;  %v281_v60 = vmul.f32 %v498_v56, %v682_v53 }
  0xda   :  { %331 = vadd.xlane.f32.xlu2 %v288_v43  ;;  %v184_v55 = vpop.f32.mrf.mxu1  ;;  %v304_v0 = vmul.f32 %v500_v58, %v682_v53  ;;  %v502_v5 = vpop.eup %501 }
  0xdb   :  { %329 = vadd.xlane.f32.xlu1 %v287_v47  ;;  %345 = vadd.xlane.f32.xlu0 %v295_v49  ;;  %v185_v57 = vadd.f32 %v678_v48, %v184_v55  ;;  %v296_v17 = vmul.f32 %v502_v5, %v682_v53 }
  0xdd   :  { %505 = vtanh.f32 %v185_v57 }
  0xde   :  { %507 = vtanh.f32 %v182_v54  ;;  %v208_v61 = vpop.f32.mrf.mxu2  ;;  %v232_v62 = vpop.f32.mrf.mxu3 }
  0xdf   :  { %v163_v1 = vpop.f32.mrf.mxu0  ;;  %v233_v2 = vadd.f32 %v678_v48, %v232_v62  ;;  %509 = vtanh.f32 %v161_v59  ;;  %v504_v6 = vpop.eup %503  ;;  %v209_v7 = vadd.f32 %v678_v48, %v208_v61 }
  0xe0   :  { %v164_v4 = vadd.f32 %v678_v48, %v163_v1  ;;  %v297_v13 = vmul.f32 %v504_v6, %v682_v53 }
  0xe2   :  { %317 = vadd.xlane.f32.xlu2 %v281_v60  ;;  %v187_v8 = vpop.f32.mrf.mxu1  ;;  %511 = vtanh.f32 %v164_v4 }
  0xe3   :  { %v506_v9 = vpop.eup %505  ;;  %315 = vadd.xlane.f32.xlu1 %v280_v63  ;;  %363 = vadd.xlane.f32.xlu0 %v304_v0  ;;  %v188_v10 = vadd.f32 %v678_v48, %v187_v8  ;;  %513 = vtanh.f32 %v233_v2 }
  0xe4   :  { %v508_v11 = vpop.eup %507  ;;  %515 = vtanh.f32 %v230_v3  ;;  %v290_v12 = vmul.f32 %v506_v9, %v682_v53 }
  0xe5   :  { %517 = vtanh.f32 %v188_v10  ;;  %v510_v16 = vpop.eup %509  ;;  %v289_v18 = vmul.f32 %v508_v11, %v682_v53 }
  0xe6   :  { %519 = vtanh.f32 %v209_v7  ;;  %v211_v14 = vpop.f32.mrf.mxu2  ;;  %v235_v15 = vpop.f32.mrf.mxu3  ;;  %v282_v33 = vmul.f32 %v510_v16, %v682_v53 }
  0xe7   :  { %v212_v19 = vadd.f32 %v678_v48, %v211_v14  ;;  %v166_v20 = vpop.f32.mrf.mxu0  ;;  %v236_v21 = vadd.f32 %v678_v48, %v235_v15 }
  0xe8   :  { %v512_v22 = vpop.eup %511  ;;  %v167_v23 = vadd.f32 %v678_v48, %v166_v20 }
  0xe9   :  { %v514_v24 = vpop.eup %513  ;;  %521 = vtanh.f32 %v212_v19  ;;  %v283_v25 = vmul.f32 %v512_v22, %v682_v53 }
  0xea   :  { %v516_v26 = vpop.eup %515  ;;  %349 = vadd.xlane.f32.xlu2 %v297_v13  ;;  %v190_v27 = vpop.f32.mrf.mxu1  ;;  %523 = vtanh.f32 %v167_v23  ;;  %v306_v28 = vmul.f32 %v514_v24, %v682_v53 }
  0xeb   :  { %v518_v29 = vpop.eup %517  ;;  %347 = vadd.xlane.f32.xlu1 %v296_v17  ;;  %333 = vadd.xlane.f32.xlu0 %v289_v18  ;;  %v191_v30 = vadd.f32 %v678_v48, %v190_v27  ;;  %525 = vtanh.f32 %v236_v21  ;;  %v305_v37 = vmul.f32 %v516_v26, %v682_v53 }
  0xec   :  { %v520_v31 = vpop.eup %519  ;;  %v291_v32 = vmul.f32 %v518_v29, %v682_v53 }
  0xed   :  { %527 = vtanh.f32 %v191_v30  ;;  %v298_v38 = vmul.f32 %v520_v31, %v682_v53 }
  0xee   :  { %v214_v34 = vpop.f32.mrf.mxu2  ;;  %v238_v35 = vpop.f32.mrf.mxu3 }
  0xef   :  { %v522_v36 = vpop.eup %521  ;;  %v215_v39 = vadd.f32 %v678_v48, %v214_v34  ;;  %v239_v40 = vadd.f32 %v678_v48, %v238_v35 }
  0xf0   :  { %v524_v41 = vpop.eup %523  ;;  %v299_v42 = vmul.f32 %v522_v36, %v682_v53 }
  0xf1   :  { %v526_v43 = vpop.eup %525  ;;  %529 = vtanh.f32 %v215_v39  ;;  %v284_v44 = vmul.f32 %v524_v41, %v682_v53 }
  0xf2   :  { %319 = vadd.xlane.f32.xlu2 %v282_v33  ;;  %531 = vtanh.f32 %v239_v40  ;;  %v307_v45 = vmul.f32 %v526_v43, %v682_v53 }
  0xf3   :  { %v528_v46 = vpop.eup %527  ;;  %365 = vadd.xlane.f32.xlu1 %v305_v37  ;;  %351 = vadd.xlane.f32.xlu0 %v298_v38 }
  0xf4   :  { %v292_v47 = vmul.f32 %v528_v46, %v682_v53 }
  0xf7   :  { %v530_v49 = vpop.eup %529 }
  0xf8   :  { %v532_v50 = vpop.eup %531  ;;  %v300_v48 = vmul.f32 %v530_v49, %v682_v53 }
  0xf9   :  { %v308_v51 = vmul.f32 %v532_v50, %v682_v53 }
  0xfa   :  { %337 = vadd.xlane.f32.xlu2 %v291_v32 }
  0xfb   :  { %335 = vadd.xlane.f32.xlu1 %v290_v12  ;;  %321 = vadd.xlane.f32.xlu0 %v283_v25 }
 0x102   :  { %355 = vadd.xlane.f32.xlu2 %v300_v48 }
 0x103   :  { %353 = vadd.xlane.f32.xlu1 %v299_v42  ;;  %339 = vadd.xlane.f32.xlu0 %v292_v47 }
 0x10a   :  { %367 = vadd.xlane.f32.xlu2 %v306_v28 }
 0x10b   :  { %323 = vadd.xlane.f32.xlu1 %v284_v44  ;;  %369 = vadd.xlane.f32.xlu0 %v307_v45 }
 0x113   :  { %371 = vadd.xlane.f32.xlu1 %v308_v51 }
 0x12e   :  { %v310_v52 = vpop.xlane.xlu0 %309 }
 0x12f   :  { %374 = vst.msk [vmem:[%s878_s4] sm:$0xff] %vm373_vm0, %v310_v52 }
 0x131   :  { %v326_v54 = vpop.xlane.xlu2 %325 }
 0x132   :  { %382 = vst.msk [vmem:[%s878_s4 + $0x40] sm:$0xff] %vm373_vm0, %v326_v54 }
 0x135   :  { %v342_v53 = vpop.xlane.xlu1 %341 }
 0x136   :  { %390 = vst.msk [vmem:[%s878_s4 + $0x80] sm:$0xff] %vm373_vm0, %v342_v53  ;;  %v358_v55 = vpop.xlane.xlu0 %357 }
 0x137   :  { %398 = vst.msk [vmem:[%s878_s4 + $0xc0] sm:$0xff] %vm373_vm0, %v358_v55 }
 0x13d   :  { %v344_v56 = vpop.xlane.xlu2 %343 }
 0x13e   :  { %v360_v57 = vpop.xlane.xlu1 %359  ;;  %391 = vst.msk [vmem:[%s878_s4 + $0x88] sm:$0xff] %vm373_vm0, %v344_v56  ;;  %v312_v58 = vpop.xlane.xlu0 %311 }
 0x13f   :  { %399 = vst.msk [vmem:[%s878_s4 + $0xc8] sm:$0xff] %vm373_vm0, %v360_v57 }
 0x140   :  { %375 = vst.msk [vmem:[%s878_s4 + $0x8] sm:$0xff] %vm373_vm0, %v312_v58 }
 0x145   :  { %v362_v59 = vpop.xlane.xlu2 %361 }
 0x146   :  { %400 = vst.msk [vmem:[%s878_s4 + $0xd0] sm:$0xff] %vm373_vm0, %v362_v59  ;;  %v314_v60 = vpop.xlane.xlu1 %313  ;;  %v328_v61 = vpop.xlane.xlu0 %327 }
 0x147   :  { %376 = vst.msk [vmem:[%s878_s4 + $0x10] sm:$0xff] %vm373_vm0, %v314_v60 }
 0x148   :  { %383 = vst.msk [vmem:[%s878_s4 + $0x48] sm:$0xff] %vm373_vm0, %v328_v61 }
 0x14d   :  { %v332_v62 = vpop.xlane.xlu2 %331 }
 0x14e   :  { %385 = vst.msk [vmem:[%s878_s4 + $0x58] sm:$0xff] %vm373_vm0, %v332_v62  ;;  %v330_v63 = vpop.xlane.xlu1 %329  ;;  %v346_v0 = vpop.xlane.xlu0 %345 }
 0x14f   :  { %384 = vst.msk [vmem:[%s878_s4 + $0x50] sm:$0xff] %vm373_vm0, %v330_v63 }
 0x150   :  { %392 = vst.msk [vmem:[%s878_s4 + $0x90] sm:$0xff] %vm373_vm0, %v346_v0 }
 0x155   :  { %v318_v1 = vpop.xlane.xlu2 %317 }
 0x156   :  { %378 = vst.msk [vmem:[%s878_s4 + $0x20] sm:$0xff] %vm373_vm0, %v318_v1  ;;  %v316_v2 = vpop.xlane.xlu1 %315  ;;  %v364_v3 = vpop.xlane.xlu0 %363 }
 0x157   :  { %377 = vst.msk [vmem:[%s878_s4 + $0x18] sm:$0xff] %vm373_vm0, %v316_v2 }
 0x158   :  { %401 = vst.msk [vmem:[%s878_s4 + $0xd8] sm:$0xff] %vm373_vm0, %v364_v3 }
 0x15d   :  { %v350_v4 = vpop.xlane.xlu2 %349 }
 0x15e   :  { %394 = vst.msk [vmem:[%s878_s4 + $0xa0] sm:$0xff] %vm373_vm0, %v350_v4  ;;  %v348_v5 = vpop.xlane.xlu1 %347  ;;  %v334_v6 = vpop.xlane.xlu0 %333 }
 0x15f   :  { %393 = vst.msk [vmem:[%s878_s4 + $0x98] sm:$0xff] %vm373_vm0, %v348_v5 }
 0x160   :  { %386 = vst.msk [vmem:[%s878_s4 + $0x60] sm:$0xff] %vm373_vm0, %v334_v6 }
 0x165   :  { %v320_v7 = vpop.xlane.xlu2 %319 }
 0x166   :  { %379 = vst.msk [vmem:[%s878_s4 + $0x28] sm:$0xff] %vm373_vm0, %v320_v7  ;;  %v366_v8 = vpop.xlane.xlu1 %365  ;;  %v352_v9 = vpop.xlane.xlu0 %351 }
 0x167   :  { %402 = vst.msk [vmem:[%s878_s4 + $0xe0] sm:$0xff] %vm373_vm0, %v366_v8 }
 0x168   :  { %395 = vst.msk [vmem:[%s878_s4 + $0xa8] sm:$0xff] %vm373_vm0, %v352_v9 }
 0x16d   :  { %v338_v10 = vpop.xlane.xlu2 %337 }
 0x16e   :  { %388 = vst.msk [vmem:[%s878_s4 + $0x70] sm:$0xff] %vm373_vm0, %v338_v10  ;;  %v336_v11 = vpop.xlane.xlu1 %335  ;;  %v322_v12 = vpop.xlane.xlu0 %321 }
 0x16f   :  { %387 = vst.msk [vmem:[%s878_s4 + $0x68] sm:$0xff] %vm373_vm0, %v336_v11 }
 0x170   :  { %380 = vst.msk [vmem:[%s878_s4 + $0x30] sm:$0xff] %vm373_vm0, %v322_v12 }
 0x175   :  { %v356_v13 = vpop.xlane.xlu2 %355 }
 0x176   :  { %397 = vst.msk [vmem:[%s878_s4 + $0xb8] sm:$0xff] %vm373_vm0, %v356_v13  ;;  %v354_v14 = vpop.xlane.xlu1 %353  ;;  %v340_v15 = vpop.xlane.xlu0 %339 }
 0x177   :  { %396 = vst.msk [vmem:[%s878_s4 + $0xb0] sm:$0xff] %vm373_vm0, %v354_v14 }
 0x178   :  { %389 = vst.msk [vmem:[%s878_s4 + $0x78] sm:$0xff] %vm373_vm0, %v340_v15 }
 0x17d   :  { %v368_v16 = vpop.xlane.xlu2 %367 }
 0x17e   :  { %403 = vst.msk [vmem:[%s878_s4 + $0xe8] sm:$0xff] %vm373_vm0, %v368_v16  ;;  %v324_v17 = vpop.xlane.xlu1 %323  ;;  %v370_v18 = vpop.xlane.xlu0 %369 }
 0x17f   :  { %381 = vst.msk [vmem:[%s878_s4 + $0x38] sm:$0xff] %vm373_vm0, %v324_v17 }
 0x180   :  { %404 = vst.msk [vmem:[%s878_s4 + $0xf0] sm:$0xff] %vm373_vm0, %v370_v18 }
 0x186   :  { %v372_v19 = vpop.xlane.xlu1 %371 }
 0x187   :  { %405 = vst.msk [vmem:[%s878_s4 + $0xf8] sm:$0xff] %vm373_vm0, %v372_v19 }
 0x188   :  { %410 = vsyncpa [#allocation3], 1 }
 0x189   :  { %411 = vsyncpa [#allocation5], 1 }
 0x18a   :  { %412 = vsyncpa [#allocation8], 1 }

// kernel: semantic_attention.3
= control target key start
LH: loop header
LB: loop body
LE: loop exit
PB: predicated region body
PF: predicated region fallthrough
CT: control target
= control target key end

     0   :  { %s371_s0 = inlined_call_operand.vmem [shape: f32[1,512], index: 0, kind: input, shape index: {}]   ;;  %s372_s1 = inlined_call_operand.vmem [shape: f32[64,512], index: 1, kind: input, shape index: {}]   ;;  %s373_s2 = inlined_call_operand.vmem [shape: f32[64,512], index: 2, kind: output, shape index: {}]  }
   0x1   :  { %v11_v0 = vld [vmem:[%s371_s0] sm:$0xf]  ;;  %v13_v2 = vld [vmem:[%s372_s1 + $0x8] sm:$0xff]  ;;  %v14_v5 = vld [vmem:[%s372_s1 + $0x10] sm:$0xff] }
   0x2   :  { %v12_v1 = vld [vmem:[%s372_s1] sm:$0xff]  ;;  %v145_v3 = vperm.slane %v11_v0, 0  ;;  %v147_v4 = vperm.slane %v11_v0, 1  ;;  %v152_v6 = vperm.slane %v11_v0, 2  ;;  %v15_v7 = vld [vmem:[%s372_s1 + $0x18] sm:$0xff]  ;;  %v157_v8 = vperm.slane %v11_v0, 3 }
   0x3   :  { %v16_v9 = vld [vmem:[%s372_s1 + $0x20] sm:$0xff]  ;;  %v17_v13 = vld [vmem:[%s372_s1 + $0x28] sm:$0xff]  ;;  %v18_v15 = vld [vmem:[%s372_s1 + $0x30] sm:$0xff] }
   0x4   :  { %v53_v10 = vmul.f32 %v145_v3, %v12_v1  ;;  %v54_v11 = vmul.f32 %v147_v4, %v13_v2  ;;  %v55_v12 = vmul.f32 %v152_v6, %v14_v5  ;;  %v56_v14 = vmul.f32 %v157_v8, %v15_v7  ;;  %v19_v17 = vld [vmem:[%s372_s1 + $0x38] sm:$0xff]  ;;  %v20_v19 = vld [vmem:[%s372_s1 + $0x40] sm:$0xff]  ;;  %v21_v21 = vld [vmem:[%s372_s1 + $0x48] sm:$0xff] }
   0x5   :  { %v57_v16 = vmul.f32 %v145_v3, %v16_v9  ;;  %v58_v18 = vmul.f32 %v147_v4, %v17_v13  ;;  %v59_v20 = vmul.f32 %v152_v6, %v18_v15  ;;  %v60_v22 = vmul.f32 %v157_v8, %v19_v17  ;;  %v22_v23 = vld [vmem:[%s372_s1 + $0x50] sm:$0xff]  ;;  %v23_v25 = vld [vmem:[%s372_s1 + $0x58] sm:$0xff]  ;;  %v24_v27 = vld [vmem:[%s372_s1 + $0x60] sm:$0xff] }
   0x6   :  { %85 = vst [vmem:[%s373_s2] sm:$0xff] %v53_v10  ;;  %v61_v24 = vmul.f32 %v145_v3, %v20_v19  ;;  %v62_v26 = vmul.f32 %v147_v4, %v21_v21  ;;  %v63_v28 = vmul.f32 %v152_v6, %v22_v23  ;;  %v25_v29 = vld [vmem:[%s372_s1 + $0x68] sm:$0xff]  ;;  %v64_v30 = vmul.f32 %v157_v8, %v23_v25  ;;  %v26_v31 = vld [vmem:[%s372_s1 + $0x70] sm:$0xff]  ;;  %v27_v33 = vld [vmem:[%s372_s1 + $0x78] sm:$0xff] }
   0x7   :  { %86 = vst [vmem:[%s373_s2 + $0x8] sm:$0xff] %v54_v11  ;;  %v65_v32 = vmul.f32 %v145_v3, %v24_v27  ;;  %v66_v34 = vmul.f32 %v147_v4, %v25_v29  ;;  %v28_v35 = vld [vmem:[%s372_s1 + $0x80] sm:$0xff]  ;;  %v67_v36 = vmul.f32 %v152_v6, %v26_v31  ;;  %v29_v37 = vld [vmem:[%s372_s1 + $0x88] sm:$0xff]  ;;  %v68_v38 = vmul.f32 %v157_v8, %v27_v33  ;;  %v30_v39 = vld [vmem:[%s372_s1 + $0x90] sm:$0xff] }
   0x8   :  { %87 = vst [vmem:[%s373_s2 + $0x10] sm:$0xff] %v55_v12  ;;  %v69_v40 = vmul.f32 %v145_v3, %v28_v35  ;;  %v31_v41 = vld [vmem:[%s372_s1 + $0x98] sm:$0xff]  ;;  %v70_v42 = vmul.f32 %v147_v4, %v29_v37  ;;  %v32_v43 = vld [vmem:[%s372_s1 + $0xa0] sm:$0xff]  ;;  %v71_v44 = vmul.f32 %v152_v6, %v30_v39  ;;  %v33_v45 = vld [vmem:[%s372_s1 + $0xa8] sm:$0xff] }
   0x9   :  { %88 = vst [vmem:[%s373_s2 + $0x18] sm:$0xff] %v56_v14  ;;  %v72_v46 = vmul.f32 %v157_v8, %v31_v41  ;;  %v34_v47 = vld [vmem:[%s372_s1 + $0xb0] sm:$0xff]  ;;  %v73_v48 = vmul.f32 %v145_v3, %v32_v43  ;;  %v35_v49 = vld [vmem:[%s372_s1 + $0xb8] sm:$0xff]  ;;  %v74_v50 = vmul.f32 %v147_v4, %v33_v45  ;;  %v36_v51 = vld [vmem:[%s372_s1 + $0xc0] sm:$0xff] }
   0xa   :  { %89 = vst [vmem:[%s373_s2 + $0x20] sm:$0xff] %v57_v16  ;;  %v75_v52 = vmul.f32 %v152_v6, %v34_v47  ;;  %v37_v53 = vld [vmem:[%s372_s1 + $0xc8] sm:$0xff]  ;;  %v76_v54 = vmul.f32 %v157_v8, %v35_v49  ;;  %v38_v55 = vld [vmem:[%s372_s1 + $0xd0] sm:$0xff]  ;;  %v77_v56 = vmul.f32 %v145_v3, %v36_v51  ;;  %v39_v57 = vld [vmem:[%s372_s1 + $0xd8] sm:$0xff] }
   0xb   :  { %90 = vst [vmem:[%s373_s2 + $0x28] sm:$0xff] %v58_v18  ;;  %v78_v58 = vmul.f32 %v147_v4, %v37_v53  ;;  %v40_v59 = vld [vmem:[%s372_s1 + $0xe0] sm:$0xff]  ;;  %v79_v60 = vmul.f32 %v152_v6, %v38_v55  ;;  %v41_v61 = vld [vmem:[%s372_s1 + $0xe8] sm:$0xff]  ;;  %v80_v62 = vmul.f32 %v157_v8, %v39_v57  ;;  %v42_v63 = vld [vmem:[%s372_s1 + $0xf0] sm:$0xff] }
   0xc   :  { %91 = vst [vmem:[%s373_s2 + $0x30] sm:$0xff] %v59_v20  ;;  %v81_v0 = vmul.f32 %v145_v3, %v40_v59  ;;  %v43_v1 = vld [vmem:[%s372_s1 + $0xf8] sm:$0xff]  ;;  %v82_v2 = vmul.f32 %v147_v4, %v41_v61  ;;  %v83_v5 = vmul.f32 %v152_v6, %v42_v63 }
   0xd   :  { %92 = vst [vmem:[%s373_s2 + $0x38] sm:$0xff] %v60_v22  ;;  %v84_v3 = vmul.f32 %v157_v8, %v43_v1 }
   0xe   :  { %93 = vst [vmem:[%s373_s2 + $0x40] sm:$0xff] %v61_v24 }
   0xf   :  { %94 = vst [vmem:[%s373_s2 + $0x48] sm:$0xff] %v62_v26 }
  0x10   :  { %95 = vst [vmem:[%s373_s2 + $0x50] sm:$0xff] %v63_v28 }
  0x11   :  { %96 = vst [vmem:[%s373_s2 + $0x58] sm:$0xff] %v64_v30 }
  0x12   :  { %97 = vst [vmem:[%s373_s2 + $0x60] sm:$0xff] %v65_v32 }
  0x13   :  { %98 = vst [vmem:[%s373_s2 + $0x68] sm:$0xff] %v66_v34 }
  0x14   :  { %99 = vst [vmem:[%s373_s2 + $0x70] sm:$0xff] %v67_v36 }
  0x15   :  { %100 = vst [vmem:[%s373_s2 + $0x78] sm:$0xff] %v68_v38 }
  0x16   :  { %101 = vst [vmem:[%s373_s2 + $0x80] sm:$0xff] %v69_v40 }
  0x17   :  { %102 = vst [vmem:[%s373_s2 + $0x88] sm:$0xff] %v70_v42 }
  0x18   :  { %103 = vst [vmem:[%s373_s2 + $0x90] sm:$0xff] %v71_v44 }
  0x19   :  { %104 = vst [vmem:[%s373_s2 + $0x98] sm:$0xff] %v72_v46 }
  0x1a   :  { %105 = vst [vmem:[%s373_s2 + $0xa0] sm:$0xff] %v73_v48 }
  0x1b   :  { %106 = vst [vmem:[%s373_s2 + $0xa8] sm:$0xff] %v74_v50 }
  0x1c   :  { %107 = vst [vmem:[%s373_s2 + $0xb0] sm:$0xff] %v75_v52 }
  0x1d   :  { %108 = vst [vmem:[%s373_s2 + $0xb8] sm:$0xff] %v76_v54 }
  0x1e   :  { %109 = vst [vmem:[%s373_s2 + $0xc0] sm:$0xff] %v77_v56 }
  0x1f   :  { %110 = vst [vmem:[%s373_s2 + $0xc8] sm:$0xff] %v78_v58 }
  0x20   :  { %111 = vst [vmem:[%s373_s2 + $0xd0] sm:$0xff] %v79_v60 }
  0x21   :  { %112 = vst [vmem:[%s373_s2 + $0xd8] sm:$0xff] %v80_v62 }
  0x22   :  { %113 = vst [vmem:[%s373_s2 + $0xe0] sm:$0xff] %v81_v0 }
  0x23   :  { %114 = vst [vmem:[%s373_s2 + $0xe8] sm:$0xff] %v82_v2 }
  0x24   :  { %115 = vst [vmem:[%s373_s2 + $0xf0] sm:$0xff] %v83_v5 }
  0x25   :  { %116 = vst [vmem:[%s373_s2 + $0xf8] sm:$0xff] %v84_v3 }

</bundles_post_ra>
